<compile_context>
chip_gen: v7x
topology: tpu7x:2x2x1
jax: 0.10.0
libtpu: 0.0.40
codegen_flags: <defaults>
</compile_context>

<pallas_src>
import functools

import jax
import jax.numpy as jnp
from jax import lax
from jax.experimental import pallas as pl
from jax.experimental.pallas import tpu as pltpu

BN_EPS = 1e-5


def _round_up(v: int, m: int) -> int:
    return (v + m - 1) // m * m


def _round_down(v: int, m: int) -> int:
    return v // m * m


def _cdiv(a: int, b: int) -> int:
    return -(-a // b)


def _vmem_budget_bytes() -> int:
    """Generation-aware VMEM budget for the double-buffered working set.

    ~2/3 of physical VMEM (v7x: 64 MiB -> ~42 MiB, v5e/v6e: 128 MiB -> ~85 MiB),
    leaving headroom for compiler-internal scratch.  Falls back to a v7x-safe
    constant if the hardware query is unavailable.
    """
    try:
        cap = int(pltpu.get_tpu_info().vmem_capacity_bytes)
    except Exception:
        cap = 64 << 20
    return max(min(cap * 2 // 3, 96 << 20), 24 << 20)


def _pick_spatial_tile(s, per_lane_bytes, fixed_bytes, budget, target, min_tiles):
    """Pick a lane-tile size for the spatial (H*W) axis.

    Returns (ts, num_tiles, ragged).  Either a single full-extent tile (no
    padding, no masking needed) or a multiple-of-128 tile; a ragged last tile
    is masked out of the BN statistics inside the kernel.
    """
    fit = _round_down(max((budget - fixed_bytes) // max(per_lane_bytes, 1), 128), 128)
    cap = max(min(target, fit), 128)
    if s <= cap and (min_tiles <= 1 or s < 256):
        return s, 1, False                         # one full-extent tile per row
    ts = min(cap, max(_round_up(_cdiv(s, max(min_tiles, 1)), 128), 128))
    ts = min(ts, _round_up(s, 128))
    num = _cdiv(s, ts)
    return ts, num, (s % ts) != 0


# ----------------------------------------------------------------------------
# Pass 1: 1x1 conv (MXU) + per-tile channel statistics
# ----------------------------------------------------------------------------
def _conv_stats_kernel(x_ref, w_ref, y_ref, stats_ref, *, s, ts, ragged):
    # x_ref:     (C_in, TS)    input dtype (cast to bf16 in-kernel; VPU slack)
    # w_ref:     (C_out, C_in) bf16, resident across the grid
    # y_ref:     (C_out, TS)   bf16, lane-dense conv-output tile
    # stats_ref: (C_out, 2)    f32, [:, 0] = sum, [:, 1] = sum of squares
    x = x_ref[...].astype(jnp.bfloat16)
    y = jnp.dot(w_ref[...], x, preferred_element_type=jnp.float32)
    y_ref[...] = y.astype(y_ref.dtype)
    if ragged:
        # Last spatial tile extends past H*W: keep its garbage lanes out of
        # the BN statistics (the y/out writebacks are masked by Pallas).
        lane = lax.broadcasted_iota(jnp.int32, y.shape, 1)
        y = jnp.where(pl.program_id(1) * ts + lane < s, y, 0.0)
    stats_ref[:, 0:1] = jnp.sum(y, axis=1, keepdims=True)
    stats_ref[:, 1:2] = jnp.sum(y * y, axis=1, keepdims=True)


# ----------------------------------------------------------------------------
# Pass 2: normalize + affine + ReLU (VPU)
# ----------------------------------------------------------------------------
def _bn_relu_kernel(y_ref, ss_ref, o_ref):
    # y_ref: (C_out, TS) bf16; ss_ref: (C_out, 2) f32 resident (scale, shift)
    y = y_ref[...].astype(jnp.float32)
    o_ref[...] = jnp.maximum(y * ss_ref[:, 0:1] + ss_ref[:, 1:2], 0.0)


# ----------------------------------------------------------------------------
# Wrapper
# ----------------------------------------------------------------------------
@functools.partial(jax.jit, static_argnames=("eps", "ts_conv", "ts_bn"))
def dim_reduction(x_nchw, conv_w, bn_gamma, bn_beta, *,
                  eps=BN_EPS, ts_conv=2048, ts_bn=8192):
    """x_nchw: (N, C_in, H, W); conv_w: (C_out, C_in) or (C_out, C_in, 1, 1)."""
    n, c_in, h, w = x_nchw.shape
    conv_w = conv_w.reshape(conv_w.shape[0], c_in)
    c_out = conv_w.shape[0]
    s = h * w

    # NCHW -> (N, C_in, H*W) is a pure metadata reshape (no copy, no transpose);
    # x keeps its stored dtype and is cast to bf16 inside the kernel.
    x_mat = x_nchw.reshape(n, c_in, s)
    w_mat = conv_w.astype(jnp.bfloat16)              # tiny one-time cast
    x_bytes = x_mat.dtype.itemsize

    budget = _vmem_budget_bytes()
    min_tiles = 2 if n == 1 else 1                   # keep both v7x TCs busy

    # ---------------- pass 1: conv + per-tile stats ----------------
    p1_fixed = 2 * c_out * c_in * 2 + 2 * c_out * 2 * 4       # w + stats (dbl-buffered)
    p1_lane = 2 * (c_in * x_bytes + c_out * 2)                # x in + bf16 y out (dbl-buffered)
    ts1, num_s1, ragged1 = _pick_spatial_tile(
        s, p1_lane, p1_fixed, budget, ts_conv, min_tiles)

    y, stats = pl.pallas_call(
        functools.partial(_conv_stats_kernel, s=s, ts=ts1, ragged=ragged1),
        grid=(n, num_s1),
        in_specs=[
            pl.BlockSpec((None, c_in, ts1), lambda i, j: (i, 0, j)),
            pl.BlockSpec((c_out, c_in), lambda i, j: (0, 0)),   # resident weights
        ],
        out_specs=[
            pl.BlockSpec((None, c_out, ts1), lambda i, j: (i, 0, j)),
            pl.BlockSpec((None, None, c_out, 2), lambda i, j: (i, j, 0, 0)),
        ],
        out_shape=[
            jax.ShapeDtypeStruct((n, c_out, s), jnp.bfloat16),     # bf16 y round-trip
            jax.ShapeDtypeStruct((n, num_s1, c_out, 2), jnp.float32),
        ],
        compiler_params=pltpu.CompilerParams(
            dimension_semantics=("parallel", "parallel"),
            vmem_limit_bytes=int(budget),
        ),
        cost_estimate=pl.CostEstimate(
            flops=2 * n * s * c_in * c_out,
            transcendentals=0,
            bytes_accessed=(n * s * c_in * x_bytes        # x
                            + c_out * c_in * 2            # w (bf16)
                            + n * s * c_out * 2           # y (bf16)
                            + n * num_s1 * c_out * 2 * 4  # stats
                            ),
        ),
    )(x_mat, w_mat)

    # ------- tiny XLA reduction: training-mode batch statistics (f32) -------
    count = float(n * s)                            # true element count
    totals = jnp.sum(stats, axis=(0, 1))            # (C_out, 2)
    mean = totals[:, 0] / count
    # NOTE: E[y^2]-E[y]^2 in f32 can cancel when |mean| >> std; clamped to >= 0.
    var = jnp.maximum(totals[:, 1] / count - mean * mean, 0.0)   # biased (train BN)
    inv_std = lax.rsqrt(var + eps)
    scale = bn_gamma.astype(jnp.float32).reshape(c_out) * inv_std
    shift = bn_beta.astype(jnp.float32).reshape(c_out) - mean * scale
    ss = jnp.stack([scale, shift], axis=1)          # (C_out, 2) resident operand
    # TODO(synk): BatchNorm2d running_mean/running_var momentum buffer updates
    # are not produced; only the forward output is computed.

    # ---------------- pass 2: normalize + affine + ReLU ----------------
    p2_fixed = 2 * c_out * 2 * 4
    p2_lane = 2 * (c_out * 2 + c_out * 4)           # bf16 y in + f32 out (dbl-buffered)
    ts2, num_s2, _ = _pick_spatial_tile(
        s, p2_lane, p2_fixed, budget, ts_bn, min_tiles)

    out = pl.pallas_call(
        _bn_relu_kernel,
        grid=(n, num_s2),
        in_specs=[
            pl.BlockSpec((None, c_out, ts2), lambda i, j: (i, 0, j)),
            pl.BlockSpec((c_out, 2), lambda i, j: (0, 0)),       # resident scale/shift
        ],
        out_specs=pl.BlockSpec((None, c_out, ts2), lambda i, j: (i, 0, j)),
        out_shape=jax.ShapeDtypeStruct((n, c_out, s), jnp.float32),
        compiler_params=pltpu.CompilerParams(
            dimension_semantics=("parallel", "parallel"),
            vmem_limit_bytes=int(budget),
        ),
        cost_estimate=pl.CostEstimate(
            flops=2 * n * s * c_out,
            transcendentals=0,
            bytes_accessed=n * s * c_out * (2 + 4) + c_out * 2 * 4,
        ),
    )(y, ss)

    return out.reshape(n, c_out, h, w)


def _reference(x, conv_w, gamma, beta, eps=BN_EPS):
    y = jnp.einsum("oc,nchw->nohw", conv_w, x)
    mean = y.mean(axis=(0, 2, 3), keepdims=True)
    var = y.var(axis=(0, 2, 3), keepdims=True)      # biased, matches train-mode BN
    return jnp.maximum(
        (y - mean) * lax.rsqrt(var + eps) * gamma.reshape(1, -1, 1, 1)
        + beta.reshape(1, -1, 1, 1), 0.0)


if __name__ == "__main__":
    key = jax.random.PRNGKey(0)

    # Small shapes consistent with the module (input_features -> dimension_reduction).
    N, C_IN, C_OUT, H, W = 2, 32, 16, 8, 8
    kx, kw = jax.random.split(key)
    x = jax.random.normal(kx, (N, C_IN, H, W), dtype=jnp.float32)

    # Conv2d weight: kaiming_normal_(mode='fan_out'), fan_out = C_out * 1 * 1.
    std = (2.0 / C_OUT) ** 0.5
    conv_w = std * jax.random.normal(kw, (C_OUT, C_IN), dtype=jnp.float32)
    # BatchNorm2d: weight=1, bias=0 (per _init_weight).
    gamma = jnp.ones((C_OUT,), jnp.float32)
    beta = jnp.zeros((C_OUT,), jnp.float32)

    # Case 1: single full-extent spatial tile (H*W = 64).
    out = jax.block_until_ready(dim_reduction(x, conv_w, gamma, beta))
    assert out.shape == (N, C_OUT, H, W)
    err = float(jnp.max(jnp.abs(out - _reference(x, conv_w, gamma, beta))))
    assert err < 5e-2, f"case1 max abs err {err}"

    # Case 2: multiple spatial tiles with a ragged last tile (H*W = 196, ts = 128),
    # exercising the in-kernel stats masking / boundary-block path.
    H2, W2 = 14, 14
    kx2, _ = jax.random.split(kw)
    x2 = jax.random.normal(kx2, (N, C_IN, H2, W2), dtype=jnp.float32)
    out2 = jax.block_until_ready(
        dim_reduction(x2, conv_w, gamma, beta, ts_conv=128, ts_bn=128))
    assert out2.shape == (N, C_OUT, H2, W2)
    err2 = float(jnp.max(jnp.abs(out2 - _reference(x2, conv_w, gamma, beta))))
    assert err2 < 5e-2, f"case2 max abs err {err2}"

    print("KERNEL_OK")
</pallas_src>

<mosaic_0001>
module attributes {stable_mosaic.version = 11 : i64} {
  func.func @_conv_stats_kernel(%arg0: i32, %arg1: i32, %arg2: memref<1x32x64xf32, #tpu.memory_space<vmem>>, %arg3: memref<16x32xbf16, #tpu.memory_space<vmem>>, %arg4: memref<1x16x64xbf16, #tpu.memory_space<vmem>>, %arg5: memref<1x1x16x2xf32, #tpu.memory_space<vmem>>) attributes {dimension_semantics = [#tpu.dimension_semantics<parallel>, #tpu.dimension_semantics<parallel>], iteration_bounds = array<i64: 2, 1>, scalar_prefetch = 0 : i64, scratch_operands = 0 : i64, tpu.core_type = #tpu.core_type<tc>, window_params = [{transform_indices = @transform_0, window_bounds = array<i64: 1, 32, 64>}, {pipeline_mode = #tpu.pipeline_mode<synchronous>, transform_indices = @transform_1, window_bounds = array<i64: 16, 32>}, {transform_indices = @transform_2, window_bounds = array<i64: 1, 16, 64>}, {transform_indices = @transform_3, window_bounds = array<i64: 1, 1, 16, 2>}]} {
    %c0 = arith.constant 0 : index
    %c0_0 = arith.constant 0 : index
    %c0_1 = arith.constant 0 : index
    %0 = vector.load %arg2[%c0, %c0_0, %c0_1] : memref<1x32x64xf32, #tpu.memory_space<vmem>>, vector<1x32x64xf32>
    %1 = vector.shape_cast %0 : vector<1x32x64xf32> to vector<32x64xf32>
    %2 = arith.truncf %1 : vector<32x64xf32> to vector<32x64xbf16>
    %c0_2 = arith.constant 0 : index
    %c0_3 = arith.constant 0 : index
    %3 = vector.load %arg3[%c0_2, %c0_3] : memref<16x32xbf16, #tpu.memory_space<vmem>>, vector<16x32xbf16>
    %cst = arith.constant dense<0.000000e+00> : vector<16x64xf32>
    %4 = tpu.matmul %3, %2, %cst {dimension_numbers = #tpu.dot_dimension_numbers<[1], [0], [0], [1], [0, 0, 1, 1], [], []>} : vector<16x32xbf16>, vector<32x64xbf16>, vector<16x64xf32> -> vector<16x64xf32>
    %5 = arith.truncf %4 : vector<16x64xf32> to vector<16x64xbf16>
    %c0_4 = arith.constant 0 : index
    %c0_5 = arith.constant 0 : index
    %c0_6 = arith.constant 0 : index
    %6 = vector.load %arg4[%c0_4, %c0_5, %c0_6] : memref<1x16x64xbf16, #tpu.memory_space<vmem>>, vector<1x16x64xbf16>
    %7 = vector.shape_cast %6 : vector<1x16x64xbf16> to vector<16x64xbf16>
    %8 = vector.shape_cast %5 : vector<16x64xbf16> to vector<1x16x64xbf16>
    tpu.vector_store %arg4[%c0_4, %c0_5, %c0_6], %8 {strides = array<i32>} : memref<1x16x64xbf16, #tpu.memory_space<vmem>>, vector<1x16x64xbf16>,
    %cst_7 = arith.constant dense<0.000000e+00> : vector<16xf32>
    %9 = vector.multi_reduction <add>, %4, %cst_7 [1] : vector<16x64xf32> to vector<16xf32>
    %10 = vector.shape_cast %9 : vector<16xf32> to vector<16x1xf32>
    %c0_8 = arith.constant 0 : index
    %c0_9 = arith.constant 0 : index
    %c0_10 = arith.constant 0 : index
    %c0_11 = arith.constant 0 : index
    %11 = vector.load %arg5[%c0_8, %c0_9, %c0_10, %c0_11] : memref<1x1x16x2xf32, #tpu.memory_space<vmem>>, vector<1x1x16x1xf32>
    %12 = vector.shape_cast %11 : vector<1x1x16x1xf32> to vector<16x1xf32>
    %13 = vector.shape_cast %10 : vector<16x1xf32> to vector<1x1x16x1xf32>
    tpu.vector_store %arg5[%c0_8, %c0_9, %c0_10, %c0_11], %13 {strides = array<i32>} : memref<1x1x16x2xf32, #tpu.memory_space<vmem>>, vector<1x1x16x1xf32>,
    %14 = arith.mulf %4, %4 : vector<16x64xf32>
    %cst_12 = arith.constant dense<0.000000e+00> : vector<16xf32>
    %15 = vector.multi_reduction <add>, %14, %cst_12 [1] : vector<16x64xf32> to vector<16xf32>
    %16 = vector.shape_cast %15 : vector<16xf32> to vector<16x1xf32>
    %c0_13 = arith.constant 0 : index
    %c0_14 = arith.constant 0 : index
    %c0_15 = arith.constant 0 : index
    %c1 = arith.constant 1 : index
    %17 = vector.load %arg5[%c0_13, %c0_14, %c0_15, %c1] : memref<1x1x16x2xf32, #tpu.memory_space<vmem>>, vector<1x1x16x1xf32>
    %18 = vector.shape_cast %17 : vector<1x1x16x1xf32> to vector<16x1xf32>
    %19 = vector.shape_cast %16 : vector<16x1xf32> to vector<1x1x16x1xf32>
    tpu.vector_store %arg5[%c0_13, %c0_14, %c0_15, %c1], %19 {strides = array<i32>} : memref<1x1x16x2xf32, #tpu.memory_space<vmem>>, vector<1x1x16x1xf32>,
    return
  }
  func.func @transform_0(%arg0: i32, %arg1: i32) -> (i32, i32, i32) {
    %c0_i32 = arith.constant 0 : i32
    %c0_i32_0 = arith.constant 0 : i32
    return %arg0, %c0_i32, %arg1 : i32, i32, i32
  }
  func.func @transform_1(%arg0: i32, %arg1: i32) -> (i32, i32) {
    %c0_i32 = arith.constant 0 : i32
    %c0_i32_0 = arith.constant 0 : i32
    %c0_i32_1 = arith.constant 0 : i32
    return %c0_i32, %c0_i32_0 : i32, i32
  }
  func.func @transform_2(%arg0: i32, %arg1: i32) -> (i32, i32, i32) {
    %c0_i32 = arith.constant 0 : i32
    %c0_i32_0 = arith.constant 0 : i32
    return %arg0, %c0_i32, %arg1 : i32, i32, i32
  }
  func.func @transform_3(%arg0: i32, %arg1: i32) -> (i32, i32, i32, i32) {
    %c0_i32 = arith.constant 0 : i32
    %c0_i32_0 = arith.constant 0 : i32
    %c0_i32_1 = arith.constant 0 : i32
    return %arg0, %arg1, %c0_i32, %c0_i32_0 : i32, i32, i32, i32
  }
}

module attributes {stable_mosaic.version = 11 : i64} {
  func.func @_bn_relu_kernel(%arg0: i32, %arg1: i32, %arg2: memref<1x16x64xbf16, #tpu.memory_space<vmem>>, %arg3: memref<16x2xf32, #tpu.memory_space<vmem>>, %arg4: memref<1x16x64xf32, #tpu.memory_space<vmem>>) attributes {dimension_semantics = [#tpu.dimension_semantics<parallel>, #tpu.dimension_semantics<parallel>], iteration_bounds = array<i64: 2, 1>, scalar_prefetch = 0 : i64, scratch_operands = 0 : i64, tpu.core_type = #tpu.core_type<tc>, window_params = [{transform_indices = @transform_0, window_bounds = array<i64: 1, 16, 64>}, {pipeline_mode = #tpu.pipeline_mode<synchronous>, transform_indices = @transform_1, window_bounds = array<i64: 16, 2>}, {transform_indices = @transform_2, window_bounds = array<i64: 1, 16, 64>}]} {
    %c0 = arith.constant 0 : index
    %c0_0 = arith.constant 0 : index
    %c0_1 = arith.constant 0 : index
    %0 = vector.load %arg2[%c0, %c0_0, %c0_1] : memref<1x16x64xbf16, #tpu.memory_space<vmem>>, vector<1x16x64xbf16>
    %1 = vector.shape_cast %0 : vector<1x16x64xbf16> to vector<16x64xbf16>
    %2 = arith.extf %1 : vector<16x64xbf16> to vector<16x64xf32>
    %c0_2 = arith.constant 0 : index
    %c0_3 = arith.constant 0 : index
    %3 = vector.load %arg3[%c0_2, %c0_3] : memref<16x2xf32, #tpu.memory_space<vmem>>, vector<16x1xf32>
    %4 = vector.broadcast %3 : vector<16x1xf32> to vector<16x64xf32>
    %5 = arith.mulf %2, %4 : vector<16x64xf32>
    %c0_4 = arith.constant 0 : index
    %c1 = arith.constant 1 : index
    %6 = vector.load %arg3[%c0_4, %c1] : memref<16x2xf32, #tpu.memory_space<vmem>>, vector<16x1xf32>
    %7 = vector.broadcast %6 : vector<16x1xf32> to vector<16x64xf32>
    %8 = arith.addf %5, %7 : vector<16x64xf32>
    %cst = arith.constant 0.000000e+00 : f32
    %9 = vector.broadcast %cst : f32 to vector<16x64xf32>
    %10 = arith.maximumf %8, %9 : vector<16x64xf32>
    %c0_5 = arith.constant 0 : index
    %c0_6 = arith.constant 0 : index
    %c0_7 = arith.constant 0 : index
    %11 = vector.load %arg4[%c0_5, %c0_6, %c0_7] : memref<1x16x64xf32, #tpu.memory_space<vmem>>, vector<1x16x64xf32>
    %12 = vector.shape_cast %11 : vector<1x16x64xf32> to vector<16x64xf32>
    %13 = vector.shape_cast %10 : vector<16x64xf32> to vector<1x16x64xf32>
    tpu.vector_store %arg4[%c0_5, %c0_6, %c0_7], %13 {strides = array<i32>} : memref<1x16x64xf32, #tpu.memory_space<vmem>>, vector<1x16x64xf32>,
    return
  }
  func.func @transform_0(%arg0: i32, %arg1: i32) -> (i32, i32, i32) {
    %c0_i32 = arith.constant 0 : i32
    %c0_i32_0 = arith.constant 0 : i32
    return %arg0, %c0_i32, %arg1 : i32, i32, i32
  }
  func.func @transform_1(%arg0: i32, %arg1: i32) -> (i32, i32) {
    %c0_i32 = arith.constant 0 : i32
    %c0_i32_0 = arith.constant 0 : i32
    %c0_i32_1 = arith.constant 0 : i32
    return %c0_i32, %c0_i32_0 : i32, i32
  }
  func.func @transform_2(%arg0: i32, %arg1: i32) -> (i32, i32, i32) {
    %c0_i32 = arith.constant 0 : i32
    %c0_i32_0 = arith.constant 0 : i32
    return %arg0, %c0_i32, %arg1 : i32, i32, i32
  }
}

</mosaic_0001>

<bundles_post_ra>
// kernel: dim_reduction.2
= control target key start
LH: loop header
LB: loop body
LE: loop exit
PB: predicated region body
PF: predicated region fallthrough
CT: control target
= control target key end

     0   :  { %s558_s12 = smov 0   ;;  %s560_s13 = smov 0   ;;  %s606_s0 = inlined_call_operand.vmem [shape: f32[2,32,64], index: 0, kind: input, shape index: {}]   ;;  %s607_s1 = inlined_call_operand.vmem [shape: bf16[16,32], index: 1, kind: input, shape index: {}]   ;;  %s608_s2 = inlined_call_operand.vmem [shape: bf16[2,16,64], index: 2, kind: output, shape index: {0}]   ;;  %s609_s3 = inlined_call_operand.vmem [shape: f32[2,1,16,2], index: 3, kind: output, shape index: {1}]  }
   0x1   :  { %s562_s14 = smov 0  }
   0x2 LB: > { %s26_s15 = sadd.s32 1, %s530_s13  ;;  %p456_p0 = scmp.ge.s32.totalorder %s534_s14, 1  ;;  %s534_s14 = sphi %s562_s14, %s14_s14   ;;  %s530_s13 = sphi %s560_s13, %s611_s13   ;;  %s526_s12 = sphi %s558_s12, %s610_s12  }
   0x3   : > { %p28_p1 = scmp.ge.s32.totalorder %s26_s15, 2  ;;  %p161_p2 = scmp.lt.s32.totalorder %s534_s14, 3 }
   0x5   : > { %s613_s15 = smov (%p28_p1, %s26_s15), 0  ;;  %p162_p3 = pnand %p456_p0, %p161_p2 }
   0x6   : > { %p200_p4 = scmp.lt.s32.totalorder (!%p162_p3), %s526_s12, 1  ;;  %v536_v0 = vmov (!%p162_p3), 0.0   ;;  %vm537_vm0 = vmmov (!%p162_p3), 0   ;;  %v511_v7 = vld [vmem:[%s607_s1] sm:$0xff] (!%p162_p3)   ;;  %vm239_vm1 = vcmask (!%p162_p3), 261120   ;;  %vm295_vm2 = vcmask (!%p162_p3), 523264  }
   0x7   : > { %165 = sbr.rel (%p162_p3) target bundleno = 389 (0x185), region = 28  ;;  %477 = vmatprep.subr.bf16.mxu0 (!%p162_p3), %v536_v0  ;;  %481 = vmatprep.mubr.msk.bf16.mxu0 (!%p162_p3), %vm537_vm0, %v536_v0  ;;  %vm292_vm3 = vcmask (!%p162_p3), 519168   ;;  %vm302_vm4 = vcmask (!%p162_p3), 7168   ;;  %vm313_vm5 = vcmask (!%p162_p3), 15368  }
   0xe   : > { %s615_s12 = smov (!%p200_p4, %s526_s12), 1 }
   0xf   : > { %s469_s16 = sshll.u32 %s615_s12, 5  ;;  %s470_s22 = sshll.u32 %s615_s12, 3 }
  0x10   : > { %s207_s19 = scalar_lea.vmem %s606_s0, %s469_s16  ;;  %s215_s25 = scalar_lea.vmem %s608_s2, %s470_s22 }
  0x11   : > { %v226_v1 = vld [vmem:[%s207_s19] sm:$0xff]  ;;  %v227_v2 = vld [vmem:[%s207_s19 + $0x8] sm:$0xff]  ;;  %v228_v3 = vld [vmem:[%s207_s19 + $0x10] sm:$0xff]  ;;  %s471_s26 = sshll.u32 %s615_s12, 4 }
  0x12   : > { %v230_v4 = vpack.c.bf16 %v227_v2, %v226_v1  ;;  %v229_v5 = vld [vmem:[%s207_s19 + $0x18] sm:$0xff]  ;;  %s224_s29 = scalar_lea.vmem %s609_s3, %s471_s26 }
  0x13   : > { %v231_v6 = vpack.c.bf16 %v229_v5, %v228_v3 }
  0x14   : > { %478 = vmatpush3.bf16.msra.mxu0 %v230_v4 }
  0x15   : > { %479 = vmatprep.subr.bf16.mxu0 %v536_v0 }
  0x18   : > { %480 = vmatpush3.bf16.msra.mxu0 %v231_v6 }
  0x1b   : > { %482 = vmatmul.mubr.msk.bf16.vlgmr.msra.gmra.mrb[0].mxu0 %vm239_vm1, %v511_v7 }
  0xee   : > { %v277_v8 = vpop.f32.mrb[0].mxu0 }
  0xef   : > { %v472_v9 = vpack.c.bf16 %v277_v8, %v277_v8  ;;  %v483_v10 = vpop.f32.mrb[1].mxu0  ;;  %v296_v11 = vsel %vm295_vm2, %v277_v8, 0.0  ;;  %v305_v12 = vmul.f32 %v277_v8, %v277_v8 }
  0xf0   : > { %297 = vadd.xlane.f32.xlu0 %v296_v11  ;;  %v280_v13 = vpop.f32.mrb[2].mxu0 }
  0xf1   : > { %293 = vst.msk [vmem:[%s215_s25] sm:$0xf] %vm292_vm3, %v472_v9  ;;  %v473_v14 = vpack.c.bf16 %v280_v13, %v280_v13  ;;  %v484_v15 = vpop.f32.mrb[3].mxu0  ;;  %v307_v16 = vsel %vm295_vm2, %v305_v12, 0.0  ;;  %v306_v17 = vmul.f32 %v280_v13, %v280_v13  ;;  %v299_v18 = vsel %vm295_vm2, %v280_v13, 0.0 }
  0xf2   : > { %308 = vadd.xlane.f32.xlu1 %v307_v16 }
  0xf3   : > { %294 = vst.msk [vmem:[%s215_s25 + $0x4] sm:$0xf] %vm292_vm3, %v473_v14  ;;  %v310_v19 = vsel %vm295_vm2, %v306_v17, 0.0 }
  0xf4   : > { %300 = vadd.xlane.f32.xlu0 %v299_v18 }
  0xf6   : > { %311 = vadd.xlane.f32.xlu1 %v310_v19 }
 0x17d   : > { %v298_v20 = vpop.xlane.xlu0 %297 }
 0x17e   : > { %303 = vst.msk [vmem:[%s224_s29] sm:$0xff] %vm302_vm4, %v298_v20 }
 0x17f   : > { %v309_v21 = vpop.xlane.xlu1 %308 }
 0x180   : > { %314 = vst.msk [vmem:[%s224_s29] sm:$0xff] %vm313_vm5, %v309_v21 }
 0x181   : > { %v301_v22 = vpop.xlane.xlu0 %300 }
 0x182   : > { %304 = vst.msk [vmem:[%s224_s29 + $0x8] sm:$0xff] %vm302_vm4, %v301_v22 }
 0x183   : > { %v312_v23 = vpop.xlane.xlu1 %311 }
 0x184   : > { %315 = vst.msk [vmem:[%s224_s29 + $0x8] sm:$0xff] %vm313_vm5, %v312_v23 }
 0x185 PF: > { %s14_s14 = sadd.s32 1, %s534_s14   ;;  %s610_s12 = smov %s530_s13 }
 0x186   : > { %p11_p5 = scmp.ge.s32.totalorder %s14_s14, 4   ;;  %s611_s13 = smov %s613_s15 }
 0x188   :  { %13 = sbr.rel (!%p11_p5) target bundleno = 2 (0x2), region = 70 }

// kernel: dim_reduction.3
= control target key start
LH: loop header
LB: loop body
LE: loop exit
PB: predicated region body
PF: predicated region fallthrough
CT: control target
= control target key end

     0   :  { %s378_s9 = smov 0   ;;  %s380_s10 = smov 0   ;;  %s417_s0 = inlined_call_operand.vmem [shape: bf16[2,16,64], index: 0, kind: input, shape index: {}]   ;;  %s418_s1 = inlined_call_operand.vmem [shape: f32[16,2], index: 1, kind: input, shape index: {}]   ;;  %s419_s2 = inlined_call_operand.vmem [shape: f32[2,16,64], index: 2, kind: output, shape index: {}]  }
   0x1   :  { %s382_s11 = smov 0  }
   0x2 LB: > { %s24_s12 = sadd.s32 1, %s355_s10  ;;  %p295_p0 = scmp.ge.s32.totalorder %s359_s11, 1  ;;  %s359_s11 = sphi %s382_s11, %s12_s11   ;;  %s355_s10 = sphi %s380_s10, %s421_s10   ;;  %s351_s9 = sphi %s378_s9, %s420_s9  }
   0x3   : > { %p26_p1 = scmp.ge.s32.totalorder %s24_s12, 2  ;;  %p131_p2 = scmp.lt.s32.totalorder %s359_s11, 3 }
   0x5   : > { %s423_s12 = smov (%p26_p1, %s24_s12), 0  ;;  %p132_p3 = pnand %p295_p0, %p131_p2 }
   0x6   : > { %v179_v0 = vld [vmem:[%s418_s1] sm:$0xff] (!%p132_p3)  ;;  %v361_v1 = vmov (!%p132_p3), 1   ;;  %v362_v2 = vmov (!%p132_p3), 0   ;;  %v180_v3 = vld [vmem:[%s418_s1 + $0x8] sm:$0xff] (!%p132_p3)  ;;  %p159_p4 = scmp.lt.s32.totalorder (!%p132_p3), %s351_s9, 1  ;;  %vm205_vm0 = vcmask (!%p132_p3), 523264  }
   0x7   : > { %135 = sbr.rel (%p132_p3) target bundleno = 147 (0x93), region = 28  ;;  %335 = vset.pattern.permute.xlu1 (!%p132_p3), %v361_v1  ;;  %334 = vset.pattern.permute.xlu0 (!%p132_p3), %v362_v2 }
   0x8   : > { %194 = vperm.xlu1 (!%p132_p3), %335, %v179_v0   ;;  %183 = vperm.xlu0 (!%p132_p3), %334, %v179_v0  }
   0xc   : > { %198 = vperm.xlu1 (!%p132_p3), %335, %v180_v3   ;;  %188 = vperm.xlu0 (!%p132_p3), %334, %v180_v3  }
   0xe   : > { %s425_s9 = smov (!%p159_p4, %s351_s9), 1 }
   0xf   : > { %s302_s17 = sshll.u32 %s425_s9, 3  ;;  %s303_s21 = sshll.u32 %s425_s9, 4 }
  0x10   : > { %336 = vset.pattern.permute.xlu0 %v361_v1  ;;  %s166_s20 = scalar_lea.vmem %s417_s0, %s302_s17  ;;  %s174_s24 = scalar_lea.vmem %s419_s2, %s303_s21 }
  0x11   : > { %v305_v4 = vld [vmem:[%s166_s20] sm:$0xff]  }
  0x12   : > { %v306_v5 = vunpack.c.l.bf16 %v305_v4  ;;  %v307_v9 = vunpack.c.h.bf16 %v305_v4 }
  0x87   : > { %v195_v6 = vpop.permute.xlu1 %194  ;;  %v184_v7 = vpop.permute.xlu0 %183 }
  0x88   : > { %v191_v8 = vmul.f32 %v306_v5, %v184_v7 }
  0x8a   : > { %v201_v10 = vadd.f32 %v195_v6, %v191_v8 }
  0x8b   : > { %v189_v11 = vpop.permute.xlu0 %188  ;;  %v199_v14 = vpop.permute.xlu1 %198 }
  0x8c   : > { %v203_v12 = vmax.f32 %v201_v10, 0.0  ;;  %v192_v13 = vmul.f32 %v307_v9, %v189_v11 }
  0x8e   : > { %206 = vst.msk [vmem:[%s174_s24] sm:$0xff] %vm205_vm0, %v203_v12  ;;  %v202_v15 = vadd.f32 %v199_v14, %v192_v13 }
  0x90   : > { %v204_v16 = vmax.f32 %v202_v15, 0.0 }
  0x92   : > { %207 = vst.msk [vmem:[%s174_s24 + $0x8] sm:$0xff] %vm205_vm0, %v204_v16 }
  0x93 PF: > { %s12_s11 = sadd.s32 1, %s359_s11   ;;  %s420_s9 = smov %s355_s10 }
  0x94   : > { %p9_p5 = scmp.ge.s32.totalorder %s12_s11, 4   ;;  %s421_s10 = smov %s423_s12 }
  0x96   :  { %11 = sbr.rel (!%p9_p5) target bundleno = 2 (0x2), region = 58 }

</bundles_post_ra>
